<compile_context>
chip_gen: v7x
topology: tpu7x:2x2x1
jax: 0.10.0
libtpu: 0.0.40
codegen_flags: <defaults>
</compile_context>

<pallas_src>
import jax
import jax.numpy as jnp
from jax.experimental import pallas as pl
from jax.experimental.pallas import tpu as pltpu

hidden_dim = 256
input_dim = 28
output_dim = 10


def _round_up(n, m):
    return ((n + m - 1) // m) * m


def rnn_forward(x, params):
    """x: (batch, seq, input_dim) float32 -> (batch, output_dim) float32."""
    w_ih, w_hh, b_ih, b_hh, w_out, b_out = params
    B, S, D = x.shape
    H = w_ih.shape[0]
    O = w_out.shape[0]

    # Pad to TPU-friendly granularities: sublane multiple of 8, lane multiple of 128.
    B_pad = _round_up(max(B, 8), 8)
    D_pad = _round_up(max(D, 128), 128)
    O_pad = _round_up(max(O, 128), 128)

    # Time-major, batch/feature zero-padded, flattened to (S*B_pad, D_pad) so the
    # input projection is one big MXU matmul (no in-kernel reshape needed).
    x_tm = jnp.transpose(x, (1, 0, 2)).astype(jnp.float32)          # (S, B, D)
    x_tm = jnp.pad(x_tm, ((0, 0), (0, B_pad - B), (0, D_pad - D)))   # (S, B_pad, D_pad)
    x_flat = x_tm.reshape(S * B_pad, D_pad)

    wih_t = jnp.pad(w_ih.T.astype(jnp.float32), ((0, D_pad - D), (0, 0)))    # (D_pad, H)
    whh_t = w_hh.T.astype(jnp.float32)                                        # (H, H)
    b = (b_ih + b_hh).reshape(1, H).astype(jnp.float32)                       # (1, H)
    wout_t = jnp.pad(w_out.T.astype(jnp.float32), ((0, 0), (0, O_pad - O)))   # (H, O_pad)
    bout = jnp.pad(b_out.reshape(1, O).astype(jnp.float32),
                   ((0, 0), (0, O_pad - O)))                                  # (1, O_pad)

    def kernel(x_ref, wih_ref, whh_ref, b_ref, wout_ref, bout_ref, out_ref):
        # Hoisted, non-recurrent part: all timesteps' input projections at once.
        pre = (jnp.dot(x_ref[...], wih_ref[...],
                       preferred_element_type=jnp.float32)
               + b_ref[...])                                   # (S*B_pad, H)
        whh = whh_ref[...]                                     # (H, H), resident

        # Serial recurrence, fully unrolled (S is small & static) so the LLO
        # scheduler sees the whole chain. h_0 = 0 => first step is just tanh(pre_0).
        h = jnp.tanh(pre[0:B_pad, :])
        for t in range(1, S):
            p_t = pre[t * B_pad:(t + 1) * B_pad, :]            # static slice
            h = jnp.tanh(p_t + jnp.dot(h, whh,
                                       preferred_element_type=jnp.float32))

        # Final projection; O padded to 128 -> lane-dense, unmasked store.
        out_ref[...] = (jnp.dot(h, wout_ref[...],
                                preferred_element_type=jnp.float32)
                        + bout_ref[...]).astype(out_ref.dtype)

    out_pad = pl.pallas_call(
        kernel,
        out_shape=jax.ShapeDtypeStruct((B_pad, O_pad), jnp.float32),
        grid_spec=pltpu.PrefetchScalarGridSpec(
            num_scalar_prefetch=0,
            grid=(1,),                                   # single invocation
            in_specs=[
                pl.BlockSpec((S * B_pad, D_pad), lambda i: (0, 0)),  # x (all steps)
                pl.BlockSpec((D_pad, H), lambda i: (0, 0)),          # W_ih^T
                pl.BlockSpec((H, H), lambda i: (0, 0)),              # W_hh^T
                pl.BlockSpec((1, H), lambda i: (0, 0)),              # b_ih + b_hh
                pl.BlockSpec((H, O_pad), lambda i: (0, 0)),          # W_out^T (padded)
                pl.BlockSpec((1, O_pad), lambda i: (0, 0)),          # b_out (padded)
            ],
            out_specs=pl.BlockSpec((B_pad, O_pad), lambda i: (0, 0)),
        ),
        compiler_params=pltpu.CompilerParams(
            dimension_semantics=("arbitrary",)),
    )(x_flat, wih_t, whh_t, b, wout_t, bout)

    return out_pad[:B, :O]


def init_params(key, input_dim, hidden_dim, output_dim):
    """Deterministic synthetic init (uniform, PyTorch-like scale 1/sqrt(hidden))."""
    ks = jax.random.split(key, 6)
    s = 1.0 / jnp.sqrt(hidden_dim).astype(jnp.float32)
    w_ih = jax.random.uniform(ks[0], (hidden_dim, input_dim), jnp.float32, -s, s)
    w_hh = jax.random.uniform(ks[1], (hidden_dim, hidden_dim), jnp.float32, -s, s)
    b_ih = jax.random.uniform(ks[2], (hidden_dim,), jnp.float32, -s, s)
    b_hh = jax.random.uniform(ks[3], (hidden_dim,), jnp.float32, -s, s)
    w_out = jax.random.uniform(ks[4], (output_dim, hidden_dim), jnp.float32, -s, s)
    b_out = jax.random.uniform(ks[5], (output_dim,), jnp.float32, -s, s)
    return (w_ih, w_hh, b_ih, b_hh, w_out, b_out)


def rnn_reference(x, params):
    """Pure-JAX reference for correctness checking."""
    w_ih, w_hh, b_ih, b_hh, w_out, b_out = params
    B, S, D = x.shape
    h = jnp.zeros((B, w_ih.shape[0]), jnp.float32)
    for t in range(S):
        h = jnp.tanh(x[:, t, :] @ w_ih.T + b_ih + h @ w_hh.T + b_hh)
    return h @ w_out.T + b_out


if __name__ == "__main__":
    key = jax.random.PRNGKey(0)
    k_x, k_p = jax.random.split(key)

    batch, seq = 2, 8
    x = jax.random.normal(k_x, (batch, seq, input_dim), jnp.float32)
    params = init_params(k_p, input_dim, hidden_dim, output_dim)

    out = rnn_forward(x, params)
    out = jax.block_until_ready(out)

    ref = rnn_reference(x, params)
    assert out.shape == (batch, output_dim)
    assert jnp.allclose(out, ref, atol=1e-4, rtol=1e-4)

    print("KERNEL_OK")
</pallas_src>

<mosaic_0001>
module attributes {stable_mosaic.version = 11 : i64} {
  func.func @kernel(%arg0: i32, %arg1: memref<64x128xf32, #tpu.memory_space<vmem>>, %arg2: memref<128x256xf32, #tpu.memory_space<vmem>>, %arg3: memref<256x256xf32, #tpu.memory_space<vmem>>, %arg4: memref<1x256xf32, #tpu.memory_space<vmem>>, %arg5: memref<256x128xf32, #tpu.memory_space<vmem>>, %arg6: memref<1x128xf32, #tpu.memory_space<vmem>>, %arg7: memref<8x128xf32, #tpu.memory_space<vmem>>) attributes {dimension_semantics = [#tpu.dimension_semantics<arbitrary>], iteration_bounds = array<i64: 1>, scalar_prefetch = 0 : i64, scratch_operands = 0 : i64, tpu.core_type = #tpu.core_type<tc>, window_params = [{pipeline_mode = #tpu.pipeline_mode<synchronous>, transform_indices = @transform_0, window_bounds = array<i64: 64, 128>}, {pipeline_mode = #tpu.pipeline_mode<synchronous>, transform_indices = @transform_1, window_bounds = array<i64: 128, 256>}, {pipeline_mode = #tpu.pipeline_mode<synchronous>, transform_indices = @transform_2, window_bounds = array<i64: 256, 256>}, {pipeline_mode = #tpu.pipeline_mode<synchronous>, transform_indices = @transform_3, window_bounds = array<i64: 1, 256>}, {pipeline_mode = #tpu.pipeline_mode<synchronous>, transform_indices = @transform_4, window_bounds = array<i64: 256, 128>}, {pipeline_mode = #tpu.pipeline_mode<synchronous>, transform_indices = @transform_5, window_bounds = array<i64: 1, 128>}, {pipeline_mode = #tpu.pipeline_mode<synchronous>, transform_indices = @transform_6, window_bounds = array<i64: 8, 128>}]} {
    %c0 = arith.constant 0 : index
    %c0_0 = arith.constant 0 : index
    %0 = vector.load %arg1[%c0, %c0_0] : memref<64x128xf32, #tpu.memory_space<vmem>>, vector<64x128xf32>
    %c0_1 = arith.constant 0 : index
    %c0_2 = arith.constant 0 : index
    %1 = vector.load %arg2[%c0_1, %c0_2] : memref<128x256xf32, #tpu.memory_space<vmem>>, vector<128x256xf32>
    %cst = arith.constant dense<0.000000e+00> : vector<64x256xf32>
    %2 = tpu.matmul %0, %1, %cst {dimension_numbers = #tpu.dot_dimension_numbers<[1], [0], [0], [1], [0, 0, 1, 1], [], []>} : vector<64x128xf32>, vector<128x256xf32>, vector<64x256xf32> -> vector<64x256xf32>
    %c0_3 = arith.constant 0 : index
    %c0_4 = arith.constant 0 : index
    %3 = vector.load %arg4[%c0_3, %c0_4] : memref<1x256xf32, #tpu.memory_space<vmem>>, vector<1x256xf32>
    %4 = vector.broadcast %3 : vector<1x256xf32> to vector<64x256xf32>
    %5 = arith.addf %2, %4 : vector<64x256xf32>
    %c0_5 = arith.constant 0 : index
    %c0_6 = arith.constant 0 : index
    %6 = vector.load %arg3[%c0_5, %c0_6] : memref<256x256xf32, #tpu.memory_space<vmem>>, vector<256x256xf32>
    %7 = vector.extract_strided_slice %5 {offsets = [0, 0], sizes = [8, 256], strides = [1, 1]} : vector<64x256xf32> to vector<8x256xf32>
    %8 = math.tanh %7 : vector<8x256xf32>
    %9 = vector.extract_strided_slice %5 {offsets = [8, 0], sizes = [8, 256], strides = [1, 1]} : vector<64x256xf32> to vector<8x256xf32>
    %cst_7 = arith.constant dense<0.000000e+00> : vector<8x256xf32>
    %10 = tpu.matmul %8, %6, %cst_7 {dimension_numbers = #tpu.dot_dimension_numbers<[1], [0], [0], [1], [0, 0, 1, 1], [], []>} : vector<8x256xf32>, vector<256x256xf32>, vector<8x256xf32> -> vector<8x256xf32>
    %11 = arith.addf %9, %10 : vector<8x256xf32>
    %12 = math.tanh %11 : vector<8x256xf32>
    %13 = vector.extract_strided_slice %5 {offsets = [16, 0], sizes = [8, 256], strides = [1, 1]} : vector<64x256xf32> to vector<8x256xf32>
    %cst_8 = arith.constant dense<0.000000e+00> : vector<8x256xf32>
    %14 = tpu.matmul %12, %6, %cst_8 {dimension_numbers = #tpu.dot_dimension_numbers<[1], [0], [0], [1], [0, 0, 1, 1], [], []>} : vector<8x256xf32>, vector<256x256xf32>, vector<8x256xf32> -> vector<8x256xf32>
    %15 = arith.addf %13, %14 : vector<8x256xf32>
    %16 = math.tanh %15 : vector<8x256xf32>
    %17 = vector.extract_strided_slice %5 {offsets = [24, 0], sizes = [8, 256], strides = [1, 1]} : vector<64x256xf32> to vector<8x256xf32>
    %cst_9 = arith.constant dense<0.000000e+00> : vector<8x256xf32>
    %18 = tpu.matmul %16, %6, %cst_9 {dimension_numbers = #tpu.dot_dimension_numbers<[1], [0], [0], [1], [0, 0, 1, 1], [], []>} : vector<8x256xf32>, vector<256x256xf32>, vector<8x256xf32> -> vector<8x256xf32>
    %19 = arith.addf %17, %18 : vector<8x256xf32>
    %20 = math.tanh %19 : vector<8x256xf32>
    %21 = vector.extract_strided_slice %5 {offsets = [32, 0], sizes = [8, 256], strides = [1, 1]} : vector<64x256xf32> to vector<8x256xf32>
    %cst_10 = arith.constant dense<0.000000e+00> : vector<8x256xf32>
    %22 = tpu.matmul %20, %6, %cst_10 {dimension_numbers = #tpu.dot_dimension_numbers<[1], [0], [0], [1], [0, 0, 1, 1], [], []>} : vector<8x256xf32>, vector<256x256xf32>, vector<8x256xf32> -> vector<8x256xf32>
    %23 = arith.addf %21, %22 : vector<8x256xf32>
    %24 = math.tanh %23 : vector<8x256xf32>
    %25 = vector.extract_strided_slice %5 {offsets = [40, 0], sizes = [8, 256], strides = [1, 1]} : vector<64x256xf32> to vector<8x256xf32>
    %cst_11 = arith.constant dense<0.000000e+00> : vector<8x256xf32>
    %26 = tpu.matmul %24, %6, %cst_11 {dimension_numbers = #tpu.dot_dimension_numbers<[1], [0], [0], [1], [0, 0, 1, 1], [], []>} : vector<8x256xf32>, vector<256x256xf32>, vector<8x256xf32> -> vector<8x256xf32>
    %27 = arith.addf %25, %26 : vector<8x256xf32>
    %28 = math.tanh %27 : vector<8x256xf32>
    %29 = vector.extract_strided_slice %5 {offsets = [48, 0], sizes = [8, 256], strides = [1, 1]} : vector<64x256xf32> to vector<8x256xf32>
    %cst_12 = arith.constant dense<0.000000e+00> : vector<8x256xf32>
    %30 = tpu.matmul %28, %6, %cst_12 {dimension_numbers = #tpu.dot_dimension_numbers<[1], [0], [0], [1], [0, 0, 1, 1], [], []>} : vector<8x256xf32>, vector<256x256xf32>, vector<8x256xf32> -> vector<8x256xf32>
    %31 = arith.addf %29, %30 : vector<8x256xf32>
    %32 = math.tanh %31 : vector<8x256xf32>
    %33 = vector.extract_strided_slice %5 {offsets = [56, 0], sizes = [8, 256], strides = [1, 1]} : vector<64x256xf32> to vector<8x256xf32>
    %cst_13 = arith.constant dense<0.000000e+00> : vector<8x256xf32>
    %34 = tpu.matmul %32, %6, %cst_13 {dimension_numbers = #tpu.dot_dimension_numbers<[1], [0], [0], [1], [0, 0, 1, 1], [], []>} : vector<8x256xf32>, vector<256x256xf32>, vector<8x256xf32> -> vector<8x256xf32>
    %35 = arith.addf %33, %34 : vector<8x256xf32>
    %36 = math.tanh %35 : vector<8x256xf32>
    %c0_14 = arith.constant 0 : index
    %c0_15 = arith.constant 0 : index
    %37 = vector.load %arg5[%c0_14, %c0_15] : memref<256x128xf32, #tpu.memory_space<vmem>>, vector<256x128xf32>
    %cst_16 = arith.constant dense<0.000000e+00> : vector<8x128xf32>
    %38 = tpu.matmul %36, %37, %cst_16 {dimension_numbers = #tpu.dot_dimension_numbers<[1], [0], [0], [1], [0, 0, 1, 1], [], []>} : vector<8x256xf32>, vector<256x128xf32>, vector<8x128xf32> -> vector<8x128xf32>
    %c0_17 = arith.constant 0 : index
    %c0_18 = arith.constant 0 : index
    %39 = vector.load %arg6[%c0_17, %c0_18] : memref<1x128xf32, #tpu.memory_space<vmem>>, vector<1x128xf32>
    %40 = vector.broadcast %39 : vector<1x128xf32> to vector<8x128xf32>
    %41 = arith.addf %38, %40 : vector<8x128xf32>
    %c0_19 = arith.constant 0 : index
    %c0_20 = arith.constant 0 : index
    %42 = vector.load %arg7[%c0_19, %c0_20] : memref<8x128xf32, #tpu.memory_space<vmem>>, vector<8x128xf32>
    tpu.vector_store %arg7[%c0_19, %c0_20], %41 {strides = array<i32>} : memref<8x128xf32, #tpu.memory_space<vmem>>, vector<8x128xf32>,
    return
  }
  func.func @transform_0(%arg0: i32) -> (i32, i32) {
    %c0_i32 = arith.constant 0 : i32
    %c0_i32_0 = arith.constant 0 : i32
    %c0_i32_1 = arith.constant 0 : i32
    return %c0_i32, %c0_i32_0 : i32, i32
  }
  func.func @transform_1(%arg0: i32) -> (i32, i32) {
    %c0_i32 = arith.constant 0 : i32
    %c0_i32_0 = arith.constant 0 : i32
    %c0_i32_1 = arith.constant 0 : i32
    return %c0_i32, %c0_i32_0 : i32, i32
  }
  func.func @transform_2(%arg0: i32) -> (i32, i32) {
    %c0_i32 = arith.constant 0 : i32
    %c0_i32_0 = arith.constant 0 : i32
    %c0_i32_1 = arith.constant 0 : i32
    return %c0_i32, %c0_i32_0 : i32, i32
  }
  func.func @transform_3(%arg0: i32) -> (i32, i32) {
    %c0_i32 = arith.constant 0 : i32
    %c0_i32_0 = arith.constant 0 : i32
    %c0_i32_1 = arith.constant 0 : i32
    return %c0_i32, %c0_i32_0 : i32, i32
  }
  func.func @transform_4(%arg0: i32) -> (i32, i32) {
    %c0_i32 = arith.constant 0 : i32
    %c0_i32_0 = arith.constant 0 : i32
    %c0_i32_1 = arith.constant 0 : i32
    return %c0_i32, %c0_i32_0 : i32, i32
  }
  func.func @transform_5(%arg0: i32) -> (i32, i32) {
    %c0_i32 = arith.constant 0 : i32
    %c0_i32_0 = arith.constant 0 : i32
    %c0_i32_1 = arith.constant 0 : i32
    return %c0_i32, %c0_i32_0 : i32, i32
  }
  func.func @transform_6(%arg0: i32) -> (i32, i32) {
    %c0_i32 = arith.constant 0 : i32
    %c0_i32_0 = arith.constant 0 : i32
    %c0_i32_1 = arith.constant 0 : i32
    return %c0_i32, %c0_i32_0 : i32, i32
  }
}

</mosaic_0001>

<bundles_post_ra>
// kernel: tpu_custom_call.1
= control target key start
LH: loop header
LB: loop body
LE: loop exit
PB: predicated region body
PF: predicated region fallthrough
CT: control target
= control target key end

     0   :  { %11 = vsyncpa [#allocation3], 0  ;;  %s2168_s0 = inlined_call_operand.hbm [shape: f32[64,128], index: 0, kind: input, shape index: {}]   ;;  %s2169_s1 = inlined_call_operand.hbm [shape: f32[128,256], index: 1, kind: input, shape index: {}]   ;;  %s2170_s2 = inlined_call_operand.hbm [shape: f32[256,256], index: 2, kind: input, shape index: {}]   ;;  %s2171_s3 = inlined_call_operand.vmem [shape: f32[1,256], index: 3, kind: input, shape index: {}]   ;;  %s2172_s4 = inlined_call_operand.hbm [shape: f32[256,128], index: 4, kind: input, shape index: {}]   ;;  %s2173_s5 = inlined_call_operand.vmem [shape: f32[1,128], index: 5, kind: input, shape index: {}]   ;;  %s2174_s6 = inlined_call_operand.hbm [shape: f32[8,128], index: 6, kind: output, shape index: {}]  }
   0x1   :  { %12 = vsyncpa [#allocation6], 0 }
   0x2   :  { %13 = vsyncpa [#allocation9], 0 }
   0x3   :  { %14 = vsyncpa [#allocation4], 0  ;;  %s1698_s21 = smov [#allocation5]   ;;  %s1580_s25 = scalar_lea.hbm %s2169_s1, 4096 }
   0x4   :  { %s32_s22 = sshll.u32 %s1698_s21, 4  ;;  %p1581_p0 = scmp.ne.s32.totalorder %s2169_s1, %s1580_s25  ;;  %s33_s22 = int_to_ptr.vmem [resolvable:$true] %s32_s22 }
   0x5   :  { %p1584_p1 = scmp.lt.u32.totalorder %s1580_s25, %s2169_s1 }
   0x7   :  { %p1586_p2 = pnand %p1584_p1, %p1581_p0 }
   0x9   :  { %1589 = shalt.err (!%p1586_p2)
}
   0xa   :  { %s1590_s30 = scalar_lea.vmem %s33_s22, 4096  ;;  %p1595_p4 = scmp.lt.s32.totalorder %s33_s22, %s33_s22 }
   0xb   :  { %p1591_p3 = scmp.ne.s32.totalorder %s33_s22, %s1590_s30  ;;  %p1596_p5 = scmp.lt.s32.totalorder %s1590_s30, %s1590_s30 }
   0xd   :  { %p1597_p6 = por %p1596_p5, %p1595_p4 }
   0xf   :  { %p1598_p7 = pnand %p1597_p6, %p1591_p3 }
  0x11   :  { %1601 = shalt.err (!%p1598_p7)
}
  0x12   :  { %s1699_s7 = smov 256   ;;  %s1700_s8 = smov 16  }
  0x13   :  { %38 = dma.hbm_to_vmem [thread:$0]  %s2169_s1, 4096, %s33_s22, [#allocation6], %s1699_s7, %s1699_s7, %s1700_s8  }
  0x14   :  { %s1701_s11 = smov [#allocation2]   ;;  %s1602_s15 = scalar_lea.hbm %s2168_s0, 1024 }
  0x15   :  { %s20_s12 = sshll.u32 %s1701_s11, 4  ;;  %p1603_p8 = scmp.ne.s32.totalorder %s2168_s0, %s1602_s15  ;;  %s21_s12 = int_to_ptr.vmem [resolvable:$true] %s20_s12 }
  0x16   :  { %p1606_p9 = scmp.lt.u32.totalorder %s1602_s15, %s2168_s0 }
  0x18   :  { %p1608_p10 = pnand %p1606_p9, %p1603_p8 }
  0x1a   :  { %1611 = shalt.err (!%p1608_p10)
}
  0x1b   :  { %s1612_s20 = scalar_lea.vmem %s21_s12, 1024  ;;  %p1617_p12 = scmp.lt.s32.totalorder %s21_s12, %s21_s12 }
  0x1c   :  { %p1613_p11 = scmp.ne.s32.totalorder %s21_s12, %s1612_s20  ;;  %p1618_p13 = scmp.lt.s32.totalorder %s1612_s20, %s1612_s20 }
  0x1e   :  { %p1619_p0 = por %p1618_p13, %p1617_p12 }
  0x20   :  { %p1620_p1 = pnand %p1619_p0, %p1613_p11 }
  0x22   :  { %1623 = shalt.err (!%p1620_p1)
}
  0x23   :  { %s1702_s1 = smov 128   ;;  %s1703_s21 = smov 8  }
  0x24   :  { %26 = dma.hbm_to_vmem [thread:$0]  %s2168_s0, 1024, %s21_s12, [#allocation3], %s1702_s1, %s1702_s1, %s1703_s21  }
  0x25   :  { %s1704_s24 = smov [#allocation7]   ;;  %s1705_s26 = smov [#allocation8]  }
  0x26   :  { %s44_s25 = sshll.u32 %s1704_s24, 4  ;;  %s58_s27 = sshll.u32 %s1705_s26, 4  ;;  %s45_s25 = int_to_ptr.vmem [resolvable:$true] %s44_s25  ;;  %s1773_s27 = int_to_ptr.vmem [resolvable:$true] %s58_s27 }
  0x27   :  { %s1624_s30 = scalar_lea.hbm %s2170_s2, 8192 }
  0x28   :  { %p1625_p2 = scmp.ne.s32.totalorder %s2170_s2, %s1624_s30  ;;  %p1628_p3 = scmp.lt.u32.totalorder %s1624_s30, %s2170_s2 }
  0x2a   :  { %p1630_p4 = pnand %p1628_p3, %p1625_p2 }
  0x2c   :  { %1633 = shalt.err (!%p1630_p4)
}
  0x2d   :  { %s1634_s0 = scalar_lea.vmem %s45_s25, 8192  ;;  %p1639_p6 = scmp.lt.s32.totalorder %s45_s25, %s45_s25 }
  0x2e   :  { %p1635_p5 = scmp.ne.s32.totalorder %s45_s25, %s1634_s0  ;;  %p1640_p7 = scmp.lt.s32.totalorder %s1634_s0, %s1634_s0 }
  0x30   :  { %p1641_p8 = por %p1640_p7, %p1639_p6 }
  0x32   :  { %p1642_p9 = pnand %p1641_p8, %p1635_p5 }
  0x34   :  { %1645 = shalt.err (!%p1642_p9)
}
  0x35   :  { %50 = dma.hbm_to_vmem [thread:$0]  %s2170_s2, 8192, %s45_s25, [#allocation6], %s1699_s7, %s1699_s7, %s1700_s8  }
  0x36   :  { %s1646_s17 = scalar_lea.hbm %s2172_s4, 4096 }
  0x37   :  { %p1647_p10 = scmp.ne.s32.totalorder %s2172_s4, %s1646_s17  ;;  %p1650_p11 = scmp.lt.u32.totalorder %s1646_s17, %s2172_s4 }
  0x39   :  { %p1652_p12 = pnand %p1650_p11, %p1647_p10 }
  0x3b   :  { %1655 = shalt.err (!%p1652_p12)
}
  0x3c   :  { %s1656_s23 = scalar_lea.vmem %s1773_s27, 4096  ;;  %p1661_p0 = scmp.lt.s32.totalorder %s1773_s27, %s1773_s27 }
  0x3d   :  { %p1657_p13 = scmp.ne.s32.totalorder %s1773_s27, %s1656_s23  ;;  %p1662_p1 = scmp.lt.s32.totalorder %s1656_s23, %s1656_s23 }
  0x3f   :  { %p1663_p2 = por %p1662_p1, %p1661_p0 }
  0x41   :  { %p1664_p3 = pnand %p1663_p2, %p1657_p13 }
  0x43   :  { %1667 = shalt.err (!%p1664_p3)
}
  0x44   :  { %64 = dma.hbm_to_vmem [thread:$0]  %s2172_s4, 4096, %s1773_s27, [#allocation9], %s1702_s1, %s1702_s1, %s1703_s21  }
  0x45   :  { %1690 = dma.done.wait [#allocation3], 1024  }
  0x46   :  { %1691 = vsyncadd [#allocation3], 4294966272 }
  0x47   :  { %1692 = dma.done.wait [#allocation6], 12288  }
  0x48   :  { %1693 = vsyncadd [#allocation6], 4294955008 }
  0x49   :  { %1694 = dma.done.wait [#allocation9], 4096  }
  0x4a   :  { %1695 = vsyncadd [#allocation9], 4294963200  ;;  %v1706_v0 = vmov 0.0   ;;  %v88_v1 = vld [vmem:[#allocation5 + $0x8] sm:$0xff]  ;;  %v90_v2 = vld [vmem:[#allocation5 + $0x18] sm:$0xff]  ;;  %s1707_s21 = smov [#allocation10]  }
  0x4b   :  { %195 = vmatprep.mubr.f32.mxu1 %v1706_v0  ;;  %v87_v3 = vld [vmem:[#allocation5] sm:$0xff]  ;;  %v998_v4 = vpack.c.bf16 %v90_v2, %v88_v1  ;;  %v89_v5 = vld [vmem:[#allocation5 + $0x10] sm:$0xff]  ;;  %v92_v6 = vld [vmem:[#allocation5 + $0x28] sm:$0xff]  ;;  %s951_s24 = sshll.u32 %s1707_s21, 4  ;;  %s952_s24 = int_to_ptr.vmem [resolvable:$true] %s951_s24 }
  0x4c   :  { %v94_v7 = vld [vmem:[#allocation5 + $0x38] sm:$0xff]  ;;  %v1000_v8 = vpack.c.bf16 %v89_v5, %v87_v3  ;;  %v91_v10 = vld [vmem:[#allocation5 + $0x20] sm:$0xff]  ;;  %v93_v11 = vld [vmem:[#allocation5 + $0x30] sm:$0xff]  ;;  %s1668_s25 = scalar_lea.vmem %s952_s24, 128  ;;  %p1673_p5 = scmp.lt.s32.totalorder %s952_s24, %s952_s24 }
  0x4d   :  { %v1002_v9 = vpack.c.bf16 %v94_v7, %v92_v6  ;;  %v96_v12 = vld [vmem:[#allocation5 + $0x48] sm:$0xff]  ;;  %999 = vmatprep.subr.bf16.mxu1 %v998_v4  ;;  %v98_v13 = vld [vmem:[#allocation5 + $0x58] sm:$0xff]  ;;  %v1004_v14 = vpack.c.bf16 %v93_v11, %v91_v10  ;;  %v95_v16 = vld [vmem:[#allocation5 + $0x40] sm:$0xff]  ;;  %p1669_p4 = scmp.ne.s32.totalorder %s952_s24, %s1668_s25  ;;  %p1674_p6 = scmp.lt.s32.totalorder %s1668_s25, %s1668_s25 }
  0x4e   :  { %1001 = vmatpush1.bf16.msra.mxu1 %v1000_v8  ;;  %v1006_v15 = vpack.c.bf16 %v98_v13, %v96_v12  ;;  %v97_v17 = vld [vmem:[#allocation5 + $0x50] sm:$0xff]  ;;  %v100_v18 = vld [vmem:[#allocation5 + $0x68] sm:$0xff]  ;;  %v102_v19 = vld [vmem:[#allocation5 + $0x78] sm:$0xff] }
  0x4f   :  { %1003 = vmatprep.subr.bf16.mxu1 %v1002_v9  ;;  %v1008_v20 = vpack.c.bf16 %v97_v17, %v95_v16  ;;  %v1010_v21 = vpack.c.bf16 %v102_v19, %v100_v18  ;;  %v99_v22 = vld [vmem:[#allocation5 + $0x60] sm:$0xff]  ;;  %v101_v23 = vld [vmem:[#allocation5 + $0x70] sm:$0xff]  ;;  %v104_v24 = vld [vmem:[#allocation5 + $0x88] sm:$0xff]  ;;  %p1675_p7 = por %p1674_p6, %p1673_p5 }
  0x50   :  { %v106_v25 = vld [vmem:[#allocation5 + $0x98] sm:$0xff]  ;;  %v245_v26 = vld [vmem:[#allocation7 + $0x8] sm:$0xff]  ;;  %v244_v28 = vld [vmem:[#allocation7] sm:$0xff]  ;;  %v1012_v29 = vpack.c.bf16 %v101_v23, %v99_v22 }
  0x51   :  { %v247_v27 = vld [vmem:[#allocation7 + $0x18] sm:$0xff]  ;;  %v246_v31 = vld [vmem:[#allocation7 + $0x10] sm:$0xff]  ;;  %v249_v32 = vld [vmem:[#allocation7 + $0x28] sm:$0xff]  ;;  %v1014_v34 = vpack.c.bf16 %v106_v25, %v104_v24  ;;  %p1676_p8 = pnand %p1675_p7, %p1669_p4 }
  0x52   :  { %1005 = vmatpush1.bf16.msra.mxu1 %v1004_v14  ;;  %v1811_v30 = vpack.c.bf16 %v247_v27, %v245_v26  ;;  %v251_v33 = vld [vmem:[#allocation7 + $0x38] sm:$0xff]  ;;  %v103_v35 = vld [vmem:[#allocation5 + $0x80] sm:$0xff]  ;;  %v105_v36 = vld [vmem:[#allocation5 + $0x90] sm:$0xff]  ;;  %v1813_v38 = vpack.c.bf16 %v246_v31, %v244_v28 }
  0x53   :  { %1007 = vmatprep.subr.bf16.mxu1 %v1006_v15  ;;  %v108_v37 = vld [vmem:[#allocation5 + $0xa8] sm:$0xff]  ;;  %v110_v39 = vld [vmem:[#allocation5 + $0xb8] sm:$0xff]  ;;  %v1815_v40 = vpack.c.bf16 %v251_v33, %v249_v32  ;;  %v248_v41 = vld [vmem:[#allocation7 + $0x20] sm:$0xff]  ;;  %v1016_v45 = vpack.c.bf16 %v105_v36, %v103_v35 }
  0x54   :  { %v250_v42 = vld [vmem:[#allocation7 + $0x30] sm:$0xff]  ;;  %1223 = vmatprep.subr.bf16.mxu0 %v1811_v30  ;;  %v253_v43 = vld [vmem:[#allocation7 + $0x48] sm:$0xff]  ;;  %v255_v44 = vld [vmem:[#allocation7 + $0x58] sm:$0xff]  ;;  %v1018_v46 = vpack.c.bf16 %v110_v39, %v108_v37 }
  0x55   :  { %1225 = vmatpush1.bf16.msra.mxu0 %v1813_v38  ;;  %v107_v47 = vld [vmem:[#allocation5 + $0xa0] sm:$0xff]  ;;  %v109_v48 = vld [vmem:[#allocation5 + $0xb0] sm:$0xff]  ;;  %v112_v49 = vld [vmem:[#allocation5 + $0xc8] sm:$0xff]  ;;  %v1820_v50 = vpack.c.bf16 %v250_v42, %v248_v41  ;;  %v1822_v52 = vpack.c.bf16 %v255_v44, %v253_v43 }
  0x56   :  { %1009 = vmatpush1.bf16.msra.mxu1 %v1008_v20  ;;  %1227 = vmatprep.subr.bf16.mxu0 %v1815_v40  ;;  %v114_v51 = vld [vmem:[#allocation5 + $0xd8] sm:$0xff]  ;;  %v252_v53 = vld [vmem:[#allocation7 + $0x40] sm:$0xff]  ;;  %v254_v54 = vld [vmem:[#allocation7 + $0x50] sm:$0xff]  ;;  %v1020_v57 = vpack.c.bf16 %v109_v48, %v107_v47 }
  0x57   :  { %1011 = vmatprep.subr.bf16.mxu1 %v1010_v21  ;;  %v257_v55 = vld [vmem:[#allocation7 + $0x68] sm:$0xff]  ;;  %v259_v56 = vld [vmem:[#allocation7 + $0x78] sm:$0xff]  ;;  %v1022_v58 = vpack.c.bf16 %v114_v51, %v112_v49  ;;  %v111_v59 = vld [vmem:[#allocation5 + $0xc0] sm:$0xff]  ;;  %v1826_v62 = vpack.c.bf16 %v254_v54, %v252_v53 }
  0x58   :  { %v113_v60 = vld [vmem:[#allocation5 + $0xd0] sm:$0xff]  ;;  %v116_v61 = vld [vmem:[#allocation5 + $0xe8] sm:$0xff]  ;;  %v118_v63 = vld [vmem:[#allocation5 + $0xf8] sm:$0xff]  ;;  %v1828_v1 = vpack.c.bf16 %v259_v56, %v257_v55 }
  0x59   :  { %1229 = vmatpush1.bf16.msra.mxu0 %v1820_v50  ;;  %v256_v2 = vld [vmem:[#allocation7 + $0x60] sm:$0xff]  ;;  %v258_v3 = vld [vmem:[#allocation7 + $0x70] sm:$0xff]  ;;  %v261_v4 = vld [vmem:[#allocation7 + $0x88] sm:$0xff]  ;;  %v1024_v6 = vpack.c.bf16 %v113_v60, %v111_v59  ;;  %v1026_v7 = vpack.c.bf16 %v118_v63, %v116_v61 }
  0x5a   :  { %1013 = vmatpush1.bf16.msra.mxu1 %v1012_v29  ;;  %1231 = vmatprep.subr.bf16.mxu0 %v1822_v52  ;;  %v263_v5 = vld [vmem:[#allocation7 + $0x98] sm:$0xff]  ;;  %v115_v8 = vld [vmem:[#allocation5 + $0xe0] sm:$0xff]  ;;  %v117_v9 = vld [vmem:[#allocation5 + $0xf0] sm:$0xff]  ;;  %v1832_v10 = vpack.c.bf16 %v258_v3, %v256_v2 }
  0x5b   :  { %1015 = vmatprep.subr.bf16.mxu1 %v1014_v34  ;;  %v1834_v11 = vpack.c.bf16 %v263_v5, %v261_v4  ;;  %v260_v12 = vld [vmem:[#allocation7 + $0x80] sm:$0xff]  ;;  %v262_v13 = vld [vmem:[#allocation7 + $0x90] sm:$0xff]  ;;  %v265_v14 = vld [vmem:[#allocation7 + $0xa8] sm:$0xff]  ;;  %v1028_v16 = vpack.c.bf16 %v117_v9, %v115_v8 }
  0x5c   :  { %v267_v15 = vld [vmem:[#allocation7 + $0xb8] sm:$0xff]  ;;  %v1838_v17 = vpack.c.bf16 %v262_v13, %v260_v12  ;;  %v264_v19 = vld [vmem:[#allocation7 + $0xa0] sm:$0xff]  ;;  %v266_v20 = vld [vmem:[#allocation7 + $0xb0] sm:$0xff] }
  0x5d   :  { %1233 = vmatpush1.bf16.msra.mxu0 %v1826_v62  ;;  %v1840_v18 = vpack.c.bf16 %v267_v15, %v265_v14  ;;  %v79_v21 = vld [vmem:[#allocation2] sm:$0xff]  ;;  %v269_v22 = vld [vmem:[#allocation7 + $0xc8] sm:$0xff]  ;;  %v271_v23 = vld [vmem:[#allocation7 + $0xd8] sm:$0xff]  ;;  %v1845_v24 = vpack.c.bf16 %v266_v20, %v264_v19 }
  0x5e   :  { %1017 = vmatpush1.bf16.msra.mxu1 %v1016_v45  ;;  %1235 = vmatprep.subr.bf16.mxu0 %v1828_v1  ;;  %v268_v25 = vld [vmem:[#allocation7 + $0xc0] sm:$0xff]  ;;  %v270_v26 = vld [vmem:[#allocation7 + $0xd0] sm:$0xff]  ;;  %v1847_v27 = vpack.c.bf16 %v271_v23, %v269_v22  ;;  %v273_v28 = vld [vmem:[#allocation7 + $0xe8] sm:$0xff] }
  0x5f   :  { %1019 = vmatprep.subr.bf16.mxu1 %v1018_v46  ;;  %v275_v29 = vld [vmem:[#allocation7 + $0xf8] sm:$0xff]  ;;  %v80_v31 = vld [vmem:[#allocation2 + $0x8] sm:$0xff]  ;;  %v1853_v32 = vpack.c.bf16 %v270_v26, %v268_v25  ;;  %v272_v33 = vld [vmem:[#allocation7 + $0xe0] sm:$0xff] }
  0x60   :  { %v274_v34 = vld [vmem:[#allocation7 + $0xf0] sm:$0xff]  ;;  %v1856_v35 = vpack.c.bf16 %v275_v29, %v273_v28  ;;  %v277_v36 = vld [vmem:[#allocation7 + $0x108] sm:$0xff]  ;;  %v279_v37 = vld [vmem:[#allocation7 + $0x118] sm:$0xff] }
  0x61   :  { %1237 = vmatpush1.bf16.msra.mxu0 %v1832_v10  ;;  %v81_v39 = vld [vmem:[#allocation2 + $0x10] sm:$0xff]  ;;  %v1862_v41 = vpack.c.bf16 %v274_v34, %v272_v33  ;;  %v276_v42 = vld [vmem:[#allocation7 + $0x100] sm:$0xff]  ;;  %v1865_v44 = vpack.c.bf16 %v279_v37, %v277_v36  ;;  %v281_v45 = vld [vmem:[#allocation7 + $0x128] sm:$0xff] }
  0x62   :  { %1021 = vmatpush1.bf16.msra.mxu1 %v1020_v57  ;;  %1239 = vmatprep.subr.bf16.mxu0 %v1834_v11  ;;  %v278_v43 = vld [vmem:[#allocation7 + $0x110] sm:$0xff]  ;;  %v283_v46 = vld [vmem:[#allocation7 + $0x138] sm:$0xff]  ;;  %v280_v49 = vld [vmem:[#allocation7 + $0x120] sm:$0xff] }
  0x63   :  { %1023 = vmatprep.subr.bf16.mxu1 %v1022_v58  ;;  %v82_v47 = vld [vmem:[#allocation2 + $0x18] sm:$0xff]  ;;  %v1871_v48 = vpack.c.bf16 %v278_v43, %v276_v42  ;;  %v282_v51 = vld [vmem:[#allocation7 + $0x130] sm:$0xff]  ;;  %v1874_v53 = vpack.c.bf16 %v283_v46, %v281_v45  ;;  %v285_v54 = vld [vmem:[#allocation7 + $0x148] sm:$0xff] }
  0x64   :  { %v287_v55 = vld [vmem:[#allocation7 + $0x158] sm:$0xff]  ;;  %v83_v56 = vld [vmem:[#allocation2 + $0x20] sm:$0xff]  ;;  %v1880_v57 = vpack.c.bf16 %v282_v51, %v280_v49  ;;  %v286_v59 = vld [vmem:[#allocation7 + $0x150] sm:$0xff] }
  0x65   :  { %1241 = vmatpush1.bf16.msra.mxu0 %v1838_v17  ;;  %v284_v58 = vld [vmem:[#allocation7 + $0x140] sm:$0xff]  ;;  %v1883_v60 = vpack.c.bf16 %v287_v55, %v285_v54  ;;  %v289_v61 = vld [vmem:[#allocation7 + $0x168] sm:$0xff]  ;;  %v291_v63 = vld [vmem:[#allocation7 + $0x178] sm:$0xff] }
  0x66   :  { %1025 = vmatpush1.bf16.msra.mxu1 %v1024_v6  ;;  %1243 = vmatprep.subr.bf16.mxu0 %v1840_v18  ;;  %v1889_v2 = vpack.c.bf16 %v286_v59, %v284_v58  ;;  %v1892_v3 = vpack.c.bf16 %v291_v63, %v289_v61  ;;  %v288_v4 = vld [vmem:[#allocation7 + $0x160] sm:$0xff]  ;;  %v290_v5 = vld [vmem:[#allocation7 + $0x170] sm:$0xff]  ;;  %v295_v8 = vld [vmem:[#allocation7 + $0x198] sm:$0xff] }
  0x67   :  { %1027 = vmatprep.subr.bf16.mxu1 %v1026_v7  ;;  %v1898_v6 = vpack.c.bf16 %v290_v5, %v288_v4  ;;  %v293_v7 = vld [vmem:[#allocation7 + $0x188] sm:$0xff]  ;;  %v292_v12 = vld [vmem:[#allocation7 + $0x180] sm:$0xff]  ;;  %v294_v13 = vld [vmem:[#allocation7 + $0x190] sm:$0xff] }
  0x68   :  { %v1912_v9 = vpack.c.bf16 %v295_v8, %v293_v7  ;;  %v1914_v14 = vpack.c.bf16 %v294_v13, %v292_v12  ;;  %v297_v15 = vld [vmem:[#allocation7 + $0x1a8] sm:$0xff]  ;;  %v298_v22 = vld [vmem:[#allocation7 + $0x1b0] sm:$0xff]  ;;  %v303_v28 = vld [vmem:[#allocation7 + $0x1d8] sm:$0xff] }
  0x69   :  { %1245 = vmatpush1.bf16.msra.mxu0 %v1845_v24  ;;  %v84_v19 = vld [vmem:[#allocation2 + $0x28] sm:$0xff]  ;;  %v85_v25 = vld [vmem:[#allocation2 + $0x30] sm:$0xff]  ;;  %v307_v37 = vld [vmem:[#allocation7 + $0x1f8] sm:$0xff] }
  0x6a   :  { %1029 = vmatpush1.bf16.msra.mxu1 %v1028_v16  ;;  %1247 = vmatprep.subr.bf16.mxu0 %v1847_v27  ;;  %v299_v16 = vld [vmem:[#allocation7 + $0x1b8] sm:$0xff]  ;;  %v301_v26 = vld [vmem:[#allocation7 + $0x1c8] sm:$0xff]  ;;  %v302_v33 = vld [vmem:[#allocation7 + $0x1d0] sm:$0xff] }
  0x6b   :  { %1031 = vmatprep.subr.bf16.mxu1 %v1811_v30  ;;  %v1920_v20 = vpack.c.bf16 %v299_v16, %v297_v15  ;;  %v1927_v29 = vpack.c.bf16 %v303_v28, %v301_v26  ;;  %v305_v36 = vld [vmem:[#allocation7 + $0x1e8] sm:$0xff]  ;;  %v306_v43 = vld [vmem:[#allocation7 + $0x1f0] sm:$0xff]  ;;  %v86_v45 = vld [vmem:[#allocation2 + $0x38] sm:$0xff] }
  0x6c   :  { %v1934_v42 = vpack.c.bf16 %v307_v37, %v305_v36  ;;  %v119_v51 = vld [vmem:[%s2171_s3] sm:$0x3] }
  0x6d   :  { %196 = vmatmul.mubr.f32.vlgmr.msra.gmra.mrb[0].mxu1 %v79_v21  ;;  %1249 = vmatpush1.bf16.msra.mxu0 %v1853_v32  ;;  %v296_v21 = vld [vmem:[#allocation7 + $0x1a0] sm:$0xff] }
  0x6e   :  { %1033 = vmatpush1.bf16.msra.mxu1 %v1813_v38  ;;  %201 = vmatprep.mubr.f32.mxu1 %v1706_v0  ;;  %v1922_v23 = vpack.c.bf16 %v298_v22, %v296_v21 }
  0x6f   :  { %1035 = vmatprep.subr.bf16.mxu1 %v1815_v40  ;;  %1251 = vmatprep.subr.bf16.mxu0 %v1856_v35 }
  0x71   :  { %202 = vmatmul.mubr.f32.gmra.mrb[2].mxu1 %v80_v31  ;;  %1253 = vmatpush1.bf16.msra.mxu0 %v1862_v41  ;;  %v300_v31 = vld [vmem:[#allocation7 + $0x1c0] sm:$0xff] }
  0x72   :  { %1037 = vmatpush1.bf16.msra.mxu1 %v1820_v50  ;;  %207 = vmatprep.mubr.f32.mxu1 %v1706_v0  ;;  %v1930_v34 = vpack.c.bf16 %v302_v33, %v300_v31 }
  0x73   :  { %1039 = vmatprep.subr.bf16.mxu1 %v1822_v52  ;;  %1255 = vmatprep.subr.bf16.mxu0 %v1865_v44 }
  0x75   :  { %208 = vmatmul.mubr.f32.gmra.mrb[4].mxu1 %v81_v39  ;;  %1257 = vmatpush1.bf16.msra.mxu0 %v1871_v48  ;;  %v304_v39 = vld [vmem:[#allocation7 + $0x1e0] sm:$0xff] }
  0x76   :  { %1041 = vmatpush1.bf16.msra.mxu1 %v1826_v62  ;;  %213 = vmatprep.mubr.f32.mxu1 %v1706_v0  ;;  %v1939_v46 = vpack.c.bf16 %v306_v43, %v304_v39 }
  0x77   :  { %1043 = vmatprep.subr.bf16.mxu1 %v1828_v1  ;;  %1259 = vmatprep.subr.bf16.mxu0 %v1874_v53 }
  0x79   :  { %214 = vmatmul.mubr.f32.gmra.mrb[6].mxu1 %v82_v47  ;;  %1261 = vmatpush1.bf16.msra.mxu0 %v1880_v57 }
  0x7a   :  { %1045 = vmatpush1.bf16.msra.mxu1 %v1832_v10  ;;  %219 = vmatprep.mubr.f32.mxu1 %v1706_v0 }
  0x7b   :  { %1047 = vmatprep.subr.bf16.mxu1 %v1834_v11  ;;  %1263 = vmatprep.subr.bf16.mxu0 %v1883_v60 }
  0x7d   :  { %220 = vmatmul.mubr.f32.gmra.mrb[8].mxu1 %v83_v56  ;;  %1265 = vmatpush1.bf16.msra.mxu0 %v1889_v2 }
  0x7e   :  { %1049 = vmatpush1.bf16.msra.mxu1 %v1838_v17  ;;  %225 = vmatprep.mubr.f32.mxu1 %v1706_v0 }
  0x7f   :  { %1051 = vmatprep.subr.bf16.mxu1 %v1840_v18  ;;  %1267 = vmatprep.subr.bf16.mxu0 %v1892_v3 }
  0x81   :  { %1269 = vmatpush1.bf16.msra.mxu0 %v1898_v6  ;;  %226 = vmatmul.mubr.f32.gmra.mrb[10].mxu1 %v84_v19 }
  0x82   :  { %1053 = vmatpush1.bf16.msra.mxu1 %v1845_v24  ;;  %1271 = vmatprep.subr.bf16.mxu0 %v1912_v9 }
  0x83   :  { %1055 = vmatprep.subr.bf16.mxu1 %v1847_v27  ;;  %231 = vmatprep.mubr.f32.mxu1 %v1706_v0 }
  0x85   :  { %1273 = vmatpush1.bf16.msra.mxu0 %v1914_v14  ;;  %232 = vmatmul.mubr.f32.gmra.mrb[12].mxu1 %v85_v25 }
  0x86   :  { %1057 = vmatpush1.bf16.msra.mxu1 %v1853_v32  ;;  %1275 = vmatprep.subr.bf16.mxu0 %v1920_v20 }
  0x87   :  { %1059 = vmatprep.subr.bf16.mxu1 %v1856_v35  ;;  %237 = vmatprep.mubr.f32.mxu1 %v1706_v0  ;;  %v121_v0 = vlaneseq }
  0x89   :  { %1277 = vmatpush1.bf16.msra.mxu0 %v1922_v23  ;;  %238 = vmatmul.mubr.f32.gmra.mrb[14].mxu1 %v86_v45  ;;  %v122_v47 = vshrl.u32 %v121_v0, 7 }
  0x8a   :  { %1061 = vmatpush1.bf16.msra.mxu1 %v1862_v41  ;;  %1279 = vmatprep.subr.bf16.mxu0 %v1927_v29 }
  0x8b   :  { %1063 = vmatprep.subr.bf16.mxu1 %v1865_v44  ;;  %v123_v49 = vsub.s32 0, %v122_v47  ;;  %v127_v54 = vsub.s32 1, %v122_v47 }
  0x8d   :  { %1281 = vmatpush1.bf16.msra.mxu0 %v1930_v34  ;;  %v1951_v55 = vrot.slane %v119_v51, %v123_v49  ;;  %v1953_v56 = vrot.slane %v119_v51, %v127_v54 }
  0x8e   :  { %1065 = vmatpush1.bf16.msra.mxu1 %v1871_v48  ;;  %1283 = vmatprep.subr.bf16.mxu0 %v1934_v42 }
  0x8f   :  { %1067 = vmatprep.subr.bf16.mxu1 %v1874_v53 }
  0x91   :  { %1285 = vmatpush1.bf16.msra.mxu0 %v1939_v46 }
  0x92   :  { %1069 = vmatpush1.bf16.msra.mxu1 %v1880_v57  ;;  %1287 = vmatprep.subr.bf16.mxu0 %v1811_v30 }
  0x93   :  { %1071 = vmatprep.subr.bf16.mxu1 %v1883_v60 }
  0x96   :  { %1073 = vmatpush1.bf16.msra.mxu1 %v1889_v2 }
  0x97   :  { %1075 = vmatprep.subr.bf16.mxu1 %v1892_v3 }
  0x9a   :  { %1077 = vmatpush1.bf16.msra.mxu1 %v1898_v6 }
  0x9b   :  { %1079 = vmatprep.subr.bf16.mxu1 %v1912_v9 }
  0x9e   :  { %1081 = vmatpush1.bf16.msra.mxu1 %v1914_v14 }
  0x9f   :  { %1083 = vmatprep.subr.bf16.mxu1 %v1920_v20 }
  0xa2   :  { %1085 = vmatpush1.bf16.msra.mxu1 %v1922_v23 }
  0xa3   :  { %1087 = vmatprep.subr.bf16.mxu1 %v1927_v29 }
  0xa6   :  { %1089 = vmatpush1.bf16.msra.mxu1 %v1930_v34 }
  0xa7   :  { %1091 = vmatprep.subr.bf16.mxu1 %v1934_v42 }
  0xaa   :  { %1093 = vmatpush1.bf16.msra.mxu1 %v1939_v46 }
  0xab   :  { %1095 = vmatprep.subr.bf16.mxu1 %v1811_v30 }
 0x140   :  { %v197_v58 = vpop.f32.mrb[0].mxu1 }
 0x141   :  { %v198_v59 = vadd.f32 %v197_v58, %v1951_v55  ;;  %v199_v61 = vpop.f32.mrb[1].mxu1 }
 0x142   :  { %v200_v63 = vadd.f32 %v199_v61, %v1953_v56 }
 0x144   :  { %1548 = vtanh.f32 %v200_v63 }
 0x145   :  { %1550 = vtanh.f32 %v198_v59 }
 0x14e   :  { %v1549_v4 = vpop.eup %1548 }
 0x14f   :  { %v1551_v5 = vpop.eup %1550  ;;  %374 = vmatprep.mubr.f32.mxu1 %v1549_v4 }
 0x150   :  { %375 = vmatmul.mubr.f32.vlgmr.msra.gmra.mrb[2].mxu1 %v1551_v5  ;;  %v1957_v7 = vpop.f32.mrb[8].mxu1 }
 0x151   :  { %1097 = vmatpush1.bf16.msra.mxu1 %v1813_v38  ;;  %v1960_v8 = vpop.f32.mrb[9].mxu1  ;;  %v222_v61 = vadd.f32 %v1957_v7, %v1951_v55 }
 0x152   :  { %1099 = vmatprep.subr.bf16.mxu1 %v1815_v40  ;;  %v224_v63 = vadd.f32 %v1960_v8, %v1953_v56 }
 0x154   :  { %v1993_v12 = vpop.f32.mrb[10].mxu1 }
 0x155   :  { %1101 = vmatpush1.bf16.msra.mxu1 %v1820_v50  ;;  %v1995_v13 = vpop.f32.mrb[11].mxu1  ;;  %v228_v7 = vadd.f32 %v1993_v12, %v1951_v55  ;;  %v859_v12 = vld [vmem:[#allocation8 + $0xc0] sm:$0xff] }
 0x156   :  { %1103 = vmatprep.subr.bf16.mxu1 %v1822_v52  ;;  %v230_v8 = vadd.f32 %v1995_v13, %v1953_v56  ;;  %v860_v13 = vld [vmem:[#allocation8 + $0xc8] sm:$0xff] }
 0x158   :  { %v1997_v15 = vpop.f32.mrb[12].mxu1 }
 0x159   :  { %1105 = vmatpush1.bf16.msra.mxu1 %v1826_v62  ;;  %v1999_v16 = vpop.f32.mrb[13].mxu1 }
 0x15a   :  { %1107 = vmatprep.subr.bf16.mxu1 %v1828_v1 }
 0x15c   :  { %v2001_v19 = vpop.f32.mrb[14].mxu1 }
 0x15d   :  { %1109 = vmatpush1.bf16.msra.mxu1 %v1832_v10  ;;  %v2003_v21 = vpop.f32.mrb[15].mxu1 }
 0x15e   :  { %1111 = vmatprep.subr.bf16.mxu1 %v1834_v11 }
 0x161   :  { %1113 = vmatpush1.bf16.msra.mxu1 %v1838_v17 }
 0x162   :  { %1115 = vmatprep.subr.bf16.mxu1 %v1840_v18 }
 0x165   :  { %1117 = vmatpush1.bf16.msra.mxu1 %v1845_v24 }
 0x166   :  { %1119 = vmatprep.subr.bf16.mxu1 %v1847_v27 }
 0x169   :  { %1121 = vmatpush1.bf16.msra.mxu1 %v1853_v32 }
 0x16a   :  { %1123 = vmatprep.subr.bf16.mxu1 %v1856_v35 }
 0x16d   :  { %1125 = vmatpush1.bf16.msra.mxu1 %v1862_v41 }
 0x16e   :  { %1127 = vmatprep.subr.bf16.mxu1 %v1865_v44 }
 0x171   :  { %1129 = vmatpush1.bf16.msra.mxu1 %v1871_v48 }
 0x172   :  { %1131 = vmatprep.subr.bf16.mxu1 %v1874_v53 }
 0x175   :  { %1133 = vmatpush1.bf16.msra.mxu1 %v1880_v57 }
 0x176   :  { %1135 = vmatprep.subr.bf16.mxu1 %v1883_v60 }
 0x179   :  { %1137 = vmatpush1.bf16.msra.mxu1 %v1889_v2 }
 0x17a   :  { %1139 = vmatprep.subr.bf16.mxu1 %v1892_v3 }
 0x17d   :  { %1141 = vmatpush1.bf16.msra.mxu1 %v1898_v6 }
 0x17e   :  { %1143 = vmatprep.subr.bf16.mxu1 %v1912_v9 }
 0x181   :  { %1145 = vmatpush1.bf16.msra.mxu1 %v1914_v14 }
 0x182   :  { %1147 = vmatprep.subr.bf16.mxu1 %v1920_v20 }
 0x185   :  { %1149 = vmatpush1.bf16.msra.mxu1 %v1922_v23 }
 0x186   :  { %1151 = vmatprep.subr.bf16.mxu1 %v1927_v29 }
 0x189   :  { %1153 = vmatpush1.bf16.msra.mxu1 %v1930_v34 }
 0x18a   :  { %1155 = vmatprep.subr.bf16.mxu1 %v1934_v42 }
 0x18d   :  { %1157 = vmatpush1.bf16.msra.mxu1 %v1939_v46 }
 0x18e   :  { %1159 = vmatprep.subr.bf16.mxu1 %v1811_v30 }
 0x223   :  { %v376_v22 = vpop.f32.mrb[2].mxu1 }
 0x224   :  { %v1510_v25 = vadd.f32 %v376_v22, %v1951_v55  ;;  %v378_v26 = vpop.f32.mrb[3].mxu1 }
 0x225   :  { %v1511_v28 = vadd.f32 %v378_v26, %v1953_v56 }
 0x227   :  { %1552 = vtanh.f32 %v1511_v28 }
 0x228   :  { %1554 = vtanh.f32 %v1510_v25 }
 0x231   :  { %v1553_v31 = vpop.eup %1552 }
 0x232   :  { %v1555_v33 = vpop.eup %1554  ;;  %449 = vmatprep.mubr.f32.mxu1 %v1553_v31 }
 0x233   :  { %450 = vmatmul.mubr.f32.vlgmr.msra.gmra.mrb[4].mxu1 %v1555_v33 }
 0x234   :  { %1161 = vmatpush1.bf16.msra.mxu1 %v1813_v38 }
 0x235   :  { %1163 = vmatprep.subr.bf16.mxu1 %v1815_v40 }
 0x238   :  { %1165 = vmatpush1.bf16.msra.mxu1 %v1820_v50 }
 0x239   :  { %1167 = vmatprep.subr.bf16.mxu1 %v1822_v52 }
 0x23c   :  { %1169 = vmatpush1.bf16.msra.mxu1 %v1826_v62 }
 0x23d   :  { %1171 = vmatprep.subr.bf16.mxu1 %v1828_v1 }
 0x240   :  { %1173 = vmatpush1.bf16.msra.mxu1 %v1832_v10 }
 0x241   :  { %1175 = vmatprep.subr.bf16.mxu1 %v1834_v11 }
 0x244   :  { %1177 = vmatpush1.bf16.msra.mxu1 %v1838_v17 }
 0x245   :  { %1179 = vmatprep.subr.bf16.mxu1 %v1840_v18 }
 0x248   :  { %1181 = vmatpush1.bf16.msra.mxu1 %v1845_v24 }
 0x249   :  { %1183 = vmatprep.subr.bf16.mxu1 %v1847_v27 }
 0x24c   :  { %1185 = vmatpush1.bf16.msra.mxu1 %v1853_v32 }
 0x24d   :  { %1187 = vmatprep.subr.bf16.mxu1 %v1856_v35 }
 0x250   :  { %1189 = vmatpush1.bf16.msra.mxu1 %v1862_v41 }
 0x251   :  { %1191 = vmatprep.subr.bf16.mxu1 %v1865_v44 }
 0x254   :  { %1193 = vmatpush1.bf16.msra.mxu1 %v1871_v48 }
 0x255   :  { %1195 = vmatprep.subr.bf16.mxu1 %v1874_v53 }
 0x258   :  { %1197 = vmatpush1.bf16.msra.mxu1 %v1880_v57 }
 0x259   :  { %1199 = vmatprep.subr.bf16.mxu1 %v1883_v60 }
 0x25c   :  { %1201 = vmatpush1.bf16.msra.mxu1 %v1889_v2 }
 0x25d   :  { %1203 = vmatprep.subr.bf16.mxu1 %v1892_v3 }
 0x260   :  { %1205 = vmatpush1.bf16.msra.mxu1 %v1898_v6 }
 0x261   :  { %1207 = vmatprep.subr.bf16.mxu1 %v1912_v9 }
 0x264   :  { %1209 = vmatpush1.bf16.msra.mxu1 %v1914_v14 }
 0x265   :  { %1211 = vmatprep.subr.bf16.mxu1 %v1920_v20 }
 0x268   :  { %1213 = vmatpush1.bf16.msra.mxu1 %v1922_v23 }
 0x269   :  { %1215 = vmatprep.subr.bf16.mxu1 %v1927_v29 }
 0x26c   :  { %1217 = vmatpush1.bf16.msra.mxu1 %v1930_v34 }
 0x26d   :  { %1219 = vmatprep.subr.bf16.mxu1 %v1934_v42 }
 0x270   :  { %1221 = vmatpush1.bf16.msra.mxu1 %v1939_v46 }
 0x306   :  { %v451_v36 = vpop.f32.mrb[4].mxu1 }
 0x307   :  { %v1512_v37 = vadd.f32 %v451_v36, %v1951_v55  ;;  %v453_v39 = vpop.f32.mrb[5].mxu1 }
 0x308   :  { %v1513_v43 = vadd.f32 %v453_v39, %v1953_v56 }
 0x30a   :  { %1556 = vtanh.f32 %v1513_v43 }
 0x30b   :  { %1558 = vtanh.f32 %v1512_v37 }
 0x314   :  { %v1557_v45 = vpop.eup %1556 }
 0x315   :  { %v1559_v0 = vpop.eup %1558  ;;  %524 = vmatprep.mubr.f32.mxu1 %v1557_v45  ;;  %v1494_v45 = vpack.c.bf16 %v860_v13, %v859_v12 }
 0x316   :  { %525 = vmatmul.mubr.f32.vlgmr.msra.gmra.mrb[6].mxu1 %v1559_v0  ;;  %v843_v0 = vld [vmem:[#allocation8 + $0x40] sm:$0xff] }
 0x3e9   :  { %v526_v47 = vpop.f32.mrb[6].mxu1 }
 0x3ea   :  { %v1514_v49 = vadd.f32 %v526_v47, %v1951_v55  ;;  %v528_v51 = vpop.f32.mrb[7].mxu1  ;;  %v844_v47 = vld [vmem:[#allocation8 + $0x48] sm:$0xff] }
 0x3eb   :  { %v1515_v54 = vadd.f32 %v528_v51, %v1953_v56 }
 0x3ed   :  { %1560 = vtanh.f32 %v1515_v54  ;;  %v845_v54 = vld [vmem:[#allocation8 + $0x50] sm:$0xff] }
 0x3ee   :  { %1562 = vtanh.f32 %v1514_v49  ;;  %v1496_v49 = vpack.c.bf16 %v844_v47, %v843_v0 }
 0x3f7   :  { %v1561_v58 = vpop.eup %1560 }
 0x3f8   :  { %v1563_v59 = vpop.eup %1562  ;;  %599 = vmatprep.mubr.f32.mxu0 %v1561_v58  ;;  %v846_v58 = vld [vmem:[#allocation8 + $0x58] sm:$0xff] }
 0x3f9   :  { %600 = vmatmul.mubr.f32.vlgmr.msra.gmra.mrb[0].mxu0 %v1563_v59  ;;  %v1500_v59 = vpack.c.bf16 %v846_v58, %v845_v54 }
 0x3fa   :  { %1289 = vmatpush1.bf16.msra.mxu0 %v1813_v38 }
 0x3fb   :  { %1291 = vmatprep.subr.bf16.mxu0 %v1815_v40 }
 0x3fe   :  { %1293 = vmatpush1.bf16.msra.mxu0 %v1820_v50 }
 0x3ff   :  { %1295 = vmatprep.subr.bf16.mxu0 %v1822_v52 }
 0x402   :  { %1297 = vmatpush1.bf16.msra.mxu0 %v1826_v62 }
 0x403   :  { %1299 = vmatprep.subr.bf16.mxu0 %v1828_v1 }
 0x406   :  { %1301 = vmatpush1.bf16.msra.mxu0 %v1832_v10 }
 0x407   :  { %1303 = vmatprep.subr.bf16.mxu0 %v1834_v11 }
 0x40a   :  { %1305 = vmatpush1.bf16.msra.mxu0 %v1838_v17 }
 0x40b   :  { %1307 = vmatprep.subr.bf16.mxu0 %v1840_v18 }
 0x40e   :  { %1309 = vmatpush1.bf16.msra.mxu0 %v1845_v24 }
 0x40f   :  { %1311 = vmatprep.subr.bf16.mxu0 %v1847_v27 }
 0x412   :  { %1313 = vmatpush1.bf16.msra.mxu0 %v1853_v32 }
 0x413   :  { %1315 = vmatprep.subr.bf16.mxu0 %v1856_v35 }
 0x416   :  { %1317 = vmatpush1.bf16.msra.mxu0 %v1862_v41 }
 0x417   :  { %1319 = vmatprep.subr.bf16.mxu0 %v1865_v44 }
 0x41a   :  { %1321 = vmatpush1.bf16.msra.mxu0 %v1871_v48 }
 0x41b   :  { %1323 = vmatprep.subr.bf16.mxu0 %v1874_v53 }
 0x41e   :  { %1325 = vmatpush1.bf16.msra.mxu0 %v1880_v57 }
 0x41f   :  { %1327 = vmatprep.subr.bf16.mxu0 %v1883_v60 }
 0x422   :  { %1329 = vmatpush1.bf16.msra.mxu0 %v1889_v2 }
 0x423   :  { %1331 = vmatprep.subr.bf16.mxu0 %v1892_v3 }
 0x426   :  { %1333 = vmatpush1.bf16.msra.mxu0 %v1898_v6 }
 0x427   :  { %1335 = vmatprep.subr.bf16.mxu0 %v1912_v9 }
 0x42a   :  { %1337 = vmatpush1.bf16.msra.mxu0 %v1914_v14 }
 0x42b   :  { %1339 = vmatprep.subr.bf16.mxu0 %v1920_v20 }
 0x42e   :  { %1341 = vmatpush1.bf16.msra.mxu0 %v1922_v23 }
 0x42f   :  { %1343 = vmatprep.subr.bf16.mxu0 %v1927_v29 }
 0x432   :  { %1345 = vmatpush1.bf16.msra.mxu0 %v1930_v34 }
 0x433   :  { %1347 = vmatprep.subr.bf16.mxu0 %v1934_v42 }
 0x436   :  { %1349 = vmatpush1.bf16.msra.mxu0 %v1939_v46 }
 0x437   :  { %1351 = vmatprep.subr.bf16.mxu0 %v1811_v30 }
 0x4cc   :  { %v601_v4 = vpop.f32.mrb[0].mxu0 }
 0x4cd   :  { %v606_v5 = vadd.f32 %v601_v4, %v222_v61  ;;  %v603_v22 = vpop.f32.mrb[1].mxu0  ;;  %v863_v61 = vld [vmem:[#allocation8 + $0xe0] sm:$0xff] }
 0x4ce   :  { %v607_v25 = vadd.f32 %v603_v22, %v224_v63  ;;  %v864_v63 = vld [vmem:[#allocation8 + $0xe8] sm:$0xff]  ;;  %v847_v4 = vld [vmem:[#allocation8 + $0x60] sm:$0xff] }
 0x4cf   :  { %v848_v22 = vld [vmem:[#allocation8 + $0x68] sm:$0xff] }
 0x4d0   :  { %1564 = vtanh.f32 %v607_v25  ;;  %v865_v25 = vld [vmem:[#allocation8 + $0xf0] sm:$0xff] }
 0x4d1   :  { %1566 = vtanh.f32 %v606_v5  ;;  %v1502_v5 = vpack.c.bf16 %v864_v63, %v863_v61 }
 0x4da   :  { %v1565_v26 = vpop.eup %1564 }
 0x4db   :  { %v1567_v28 = vpop.eup %1566  ;;  %674 = vmatprep.mubr.f32.mxu0 %v1565_v26  ;;  %v866_v26 = vld [vmem:[#allocation8 + $0xf8] sm:$0xff] }
 0x4dc   :  { %675 = vmatmul.mubr.f32.vlgmr.msra.gmra.mrb[2].mxu0 %v1567_v28  ;;  %v1504_v28 = vpack.c.bf16 %v848_v22, %v847_v4 }
 0x4dd   :  { %1353 = vmatpush1.bf16.msra.mxu0 %v1813_v38 }
 0x4de   :  { %1355 = vmatprep.subr.bf16.mxu0 %v1815_v40 }
 0x4e1   :  { %1357 = vmatpush1.bf16.msra.mxu0 %v1820_v50 }
 0x4e2   :  { %1359 = vmatprep.subr.bf16.mxu0 %v1822_v52 }
 0x4e5   :  { %1361 = vmatpush1.bf16.msra.mxu0 %v1826_v62 }
 0x4e6   :  { %1363 = vmatprep.subr.bf16.mxu0 %v1828_v1 }
 0x4e9   :  { %1365 = vmatpush1.bf16.msra.mxu0 %v1832_v10 }
 0x4ea   :  { %1367 = vmatprep.subr.bf16.mxu0 %v1834_v11 }
 0x4ed   :  { %1369 = vmatpush1.bf16.msra.mxu0 %v1838_v17 }
 0x4ee   :  { %1371 = vmatprep.subr.bf16.mxu0 %v1840_v18 }
 0x4f1   :  { %1373 = vmatpush1.bf16.msra.mxu0 %v1845_v24 }
 0x4f2   :  { %1375 = vmatprep.subr.bf16.mxu0 %v1847_v27 }
 0x4f5   :  { %1377 = vmatpush1.bf16.msra.mxu0 %v1853_v32 }
 0x4f6   :  { %1379 = vmatprep.subr.bf16.mxu0 %v1856_v35 }
 0x4f9   :  { %1381 = vmatpush1.bf16.msra.mxu0 %v1862_v41 }
 0x4fa   :  { %1383 = vmatprep.subr.bf16.mxu0 %v1865_v44 }
 0x4fd   :  { %1385 = vmatpush1.bf16.msra.mxu0 %v1871_v48 }
 0x4fe   :  { %1387 = vmatprep.subr.bf16.mxu0 %v1874_v53 }
 0x501   :  { %1389 = vmatpush1.bf16.msra.mxu0 %v1880_v57 }
 0x502   :  { %1391 = vmatprep.subr.bf16.mxu0 %v1883_v60 }
 0x505   :  { %1393 = vmatpush1.bf16.msra.mxu0 %v1889_v2 }
 0x506   :  { %1395 = vmatprep.subr.bf16.mxu0 %v1892_v3 }
 0x509   :  { %1397 = vmatpush1.bf16.msra.mxu0 %v1898_v6 }
 0x50a   :  { %1399 = vmatprep.subr.bf16.mxu0 %v1912_v9 }
 0x50d   :  { %1401 = vmatpush1.bf16.msra.mxu0 %v1914_v14 }
 0x50e   :  { %1403 = vmatprep.subr.bf16.mxu0 %v1920_v20 }
 0x511   :  { %1405 = vmatpush1.bf16.msra.mxu0 %v1922_v23 }
 0x512   :  { %1407 = vmatprep.subr.bf16.mxu0 %v1927_v29 }
 0x515   :  { %1409 = vmatpush1.bf16.msra.mxu0 %v1930_v34 }
 0x516   :  { %1411 = vmatprep.subr.bf16.mxu0 %v1934_v42 }
 0x519   :  { %1413 = vmatpush1.bf16.msra.mxu0 %v1939_v46 }
 0x51a   :  { %1415 = vmatprep.subr.bf16.mxu0 %v1811_v30  ;;  %v851_v30 = vld [vmem:[#allocation8 + $0x80] sm:$0xff] }
 0x5af   :  { %v676_v31 = vpop.f32.mrb[2].mxu0 }
 0x5b0   :  { %v681_v33 = vadd.f32 %v676_v31, %v228_v7  ;;  %v678_v36 = vpop.f32.mrb[3].mxu0  ;;  %v1506_v7 = vpack.c.bf16 %v866_v26, %v865_v25  ;;  %v850_v31 = vld [vmem:[#allocation8 + $0x78] sm:$0xff] }
 0x5b1   :  { %v682_v37 = vadd.f32 %v678_v36, %v230_v8  ;;  %v849_v8 = vld [vmem:[#allocation8 + $0x70] sm:$0xff]  ;;  %v240_v36 = vadd.f32 %v2001_v19, %v1951_v55 }
 0x5b3   :  { %1568 = vtanh.f32 %v682_v37  ;;  %v242_v37 = vadd.f32 %v2003_v21, %v1953_v56 }
 0x5b4   :  { %1570 = vtanh.f32 %v681_v33  ;;  %v1508_v33 = vpack.c.bf16 %v850_v31, %v849_v8 }
 0x5bd   :  { %v1569_v39 = vpop.eup %1568 }
 0x5be   :  { %v1571_v43 = vpop.eup %1570  ;;  %749 = vmatprep.mubr.f32.mxu0 %v1569_v39 }
 0x5bf   :  { %750 = vmatmul.mubr.f32.vlgmr.msra.gmra.mrb[4].mxu0 %v1571_v43 }
 0x5c0   :  { %1417 = vmatpush1.bf16.msra.mxu0 %v1813_v38  ;;  %v852_v38 = vld [vmem:[#allocation8 + $0x88] sm:$0xff] }
 0x5c1   :  { %1419 = vmatprep.subr.bf16.mxu0 %v1815_v40  ;;  %v835_v40 = vld [vmem:[#allocation8] sm:$0xff] }
 0x5c4   :  { %1421 = vmatpush1.bf16.msra.mxu0 %v1820_v50  ;;  %v1478_v50 = vpack.c.bf16 %v852_v38, %v851_v30 }
 0x5c5   :  { %1423 = vmatprep.subr.bf16.mxu0 %v1822_v52  ;;  %v836_v52 = vld [vmem:[#allocation8 + $0x8] sm:$0xff] }
 0x5c6   :  { %1479 = vmatprep.subr.bf16.mxu1 %v1478_v50 }
 0x5c8   :  { %1425 = vmatpush1.bf16.msra.mxu0 %v1826_v62  ;;  %v853_v62 = vld [vmem:[#allocation8 + $0x90] sm:$0xff] }
 0x5c9   :  { %1427 = vmatprep.subr.bf16.mxu0 %v1828_v1  ;;  %v854_v1 = vld [vmem:[#allocation8 + $0x98] sm:$0xff] }
 0x5cc   :  { %1429 = vmatpush1.bf16.msra.mxu0 %v1832_v10  ;;  %v1480_v10 = vpack.c.bf16 %v836_v52, %v835_v40 }
 0x5cd   :  { %1431 = vmatprep.subr.bf16.mxu0 %v1834_v11  ;;  %v1482_v11 = vpack.c.bf16 %v854_v1, %v853_v62  ;;  %v962_v62 = vld [vmem:[%s2173_s5] ss:$0 sm:$0xff] }
 0x5ce   :  { %1481 = vmatpush3.bf16.msra.mxu1 %v1480_v10 }
 0x5cf   :  { %1483 = vmatprep.subr.bf16.mxu1 %v1482_v11 }
 0x5d0   :  { %1433 = vmatpush1.bf16.msra.mxu0 %v1838_v17  ;;  %v837_v17 = vld [vmem:[#allocation8 + $0x10] sm:$0xff] }
 0x5d1   :  { %1435 = vmatprep.subr.bf16.mxu0 %v1840_v18  ;;  %v838_v18 = vld [vmem:[#allocation8 + $0x18] sm:$0xff] }
 0x5d4   :  { %1437 = vmatpush1.bf16.msra.mxu0 %v1845_v24  ;;  %v855_v24 = vld [vmem:[#allocation8 + $0xa0] sm:$0xff] }
 0x5d5   :  { %1439 = vmatprep.subr.bf16.mxu0 %v1847_v27  ;;  %v856_v27 = vld [vmem:[#allocation8 + $0xa8] sm:$0xff] }
 0x5d8   :  { %1441 = vmatpush1.bf16.msra.mxu0 %v1853_v32  ;;  %v1484_v32 = vpack.c.bf16 %v838_v18, %v837_v17 }
 0x5d9   :  { %1443 = vmatprep.subr.bf16.mxu0 %v1856_v35  ;;  %v1486_v35 = vpack.c.bf16 %v856_v27, %v855_v24 }
 0x5da   :  { %1485 = vmatpush3.bf16.msra.mxu1 %v1484_v32 }
 0x5db   :  { %1487 = vmatprep.subr.bf16.mxu1 %v1486_v35 }
 0x5dc   :  { %1445 = vmatpush1.bf16.msra.mxu0 %v1862_v41  ;;  %v839_v41 = vld [vmem:[#allocation8 + $0x20] sm:$0xff] }
 0x5dd   :  { %1447 = vmatprep.subr.bf16.mxu0 %v1865_v44  ;;  %v840_v44 = vld [vmem:[#allocation8 + $0x28] sm:$0xff] }
 0x5e0   :  { %1449 = vmatpush1.bf16.msra.mxu0 %v1871_v48  ;;  %v857_v48 = vld [vmem:[#allocation8 + $0xb0] sm:$0xff] }
 0x5e1   :  { %1451 = vmatprep.subr.bf16.mxu0 %v1874_v53  ;;  %v858_v53 = vld [vmem:[#allocation8 + $0xb8] sm:$0xff] }
 0x5e4   :  { %1453 = vmatpush1.bf16.msra.mxu0 %v1880_v57  ;;  %v1488_v57 = vpack.c.bf16 %v840_v44, %v839_v41 }
 0x5e5   :  { %1455 = vmatprep.subr.bf16.mxu0 %v1883_v60  ;;  %v1490_v60 = vpack.c.bf16 %v858_v53, %v857_v48 }
 0x5e6   :  { %1489 = vmatpush3.bf16.msra.mxu1 %v1488_v57 }
 0x5e7   :  { %1491 = vmatprep.subr.bf16.mxu1 %v1490_v60 }
 0x5e8   :  { %1457 = vmatpush1.bf16.msra.mxu0 %v1889_v2  ;;  %v841_v2 = vld [vmem:[#allocation8 + $0x30] sm:$0xff] }
 0x5e9   :  { %1459 = vmatprep.subr.bf16.mxu0 %v1892_v3  ;;  %v842_v3 = vld [vmem:[#allocation8 + $0x38] sm:$0xff] }
 0x5ec   :  { %1461 = vmatpush1.bf16.msra.mxu0 %v1898_v6  ;;  %v1492_v6 = vpack.c.bf16 %v842_v3, %v841_v2 }
 0x5ed   :  { %1463 = vmatprep.subr.bf16.mxu0 %v1912_v9  ;;  %v234_v9 = vadd.f32 %v1997_v15, %v1951_v55  ;;  %v861_v15 = vld [vmem:[#allocation8 + $0xd0] sm:$0xff] }
 0x5ee   :  { %1493 = vmatpush3.bf16.msra.mxu1 %v1492_v6 }
 0x5ef   :  { %1495 = vmatprep.subr.bf16.mxu1 %v1494_v45 }
 0x5f0   :  { %1465 = vmatpush1.bf16.msra.mxu0 %v1914_v14  ;;  %v236_v14 = vadd.f32 %v1999_v16, %v1953_v56  ;;  %v862_v16 = vld [vmem:[#allocation8 + $0xd8] sm:$0xff] }
 0x5f1   :  { %1467 = vmatprep.subr.bf16.mxu0 %v1920_v20  ;;  %v1498_v51 = vpack.c.bf16 %v862_v16, %v861_v15 }
 0x5f2   :  { %1497 = vmatpush3.bf16.msra.mxu1 %v1496_v49 }
 0x5f3   :  { %1499 = vmatprep.subr.bf16.mxu1 %v1498_v51 }
 0x5f4   :  { %1469 = vmatpush1.bf16.msra.mxu0 %v1922_v23 }
 0x5f5   :  { %1471 = vmatprep.subr.bf16.mxu0 %v1927_v29 }
 0x5f6   :  { %1501 = vmatpush3.bf16.msra.mxu1 %v1500_v59 }
 0x5f7   :  { %1503 = vmatprep.subr.bf16.mxu1 %v1502_v5 }
 0x5f8   :  { %1473 = vmatpush1.bf16.msra.mxu0 %v1930_v34 }
 0x5f9   :  { %1475 = vmatprep.subr.bf16.mxu0 %v1934_v42 }
 0x5fa   :  { %1505 = vmatpush3.bf16.msra.mxu1 %v1504_v28 }
 0x5fb   :  { %1507 = vmatprep.subr.bf16.mxu1 %v1506_v7 }
 0x5fc   :  { %1477 = vmatpush1.bf16.msra.mxu0 %v1939_v46 }
 0x5fe   :  { %1509 = vmatpush3.bf16.msra.mxu1 %v1508_v33 }
 0x692   :  { %v751_v20 = vpop.f32.mrb[4].mxu0 }
 0x693   :  { %v756_v23 = vadd.f32 %v751_v20, %v234_v9  ;;  %v753_v29 = vpop.f32.mrb[5].mxu0 }
 0x694   :  { %v757_v34 = vadd.f32 %v753_v29, %v236_v14 }
 0x696   :  { %1572 = vtanh.f32 %v757_v34 }
 0x697   :  { %1574 = vtanh.f32 %v756_v23 }
 0x6a0   :  { %v1573_v42 = vpop.eup %1572 }
 0x6a1   :  { %v1575_v46 = vpop.eup %1574  ;;  %824 = vmatprep.mubr.f32.mxu0 %v1573_v42 }
 0x6a2   :  { %825 = vmatmul.mubr.f32.vlgmr.msra.gmra.mrb[6].mxu0 %v1575_v46 }
 0x775   :  { %v826_v39 = vpop.f32.mrb[6].mxu0 }
 0x776   :  { %v831_v43 = vadd.f32 %v826_v39, %v240_v36  ;;  %v828_v30 = vpop.f32.mrb[7].mxu0 }
 0x777   :  { %v832_v38 = vadd.f32 %v828_v30, %v242_v37 }
 0x779   :  { %1576 = vtanh.f32 %v832_v38 }
 0x77a   :  { %1578 = vtanh.f32 %v831_v43 }
 0x783   :  { %v1577_v40 = vpop.eup %1576 }
 0x784   :  { %v1579_v50 = vpop.eup %1578  ;;  %938 = vmatprep.mubr.f32.mxu1 %v1577_v40 }
 0x785   :  { %939 = vmatmul.mubr.f32.vlgmr.msra.gmra.mrb[16].mxu1 %v1579_v50 }
 0x858   :  { %v995_v52 = vpop.f32.mrb[16].mxu1 }
 0x859   :  { %v996_v1 = vpop.f32.mrb[17].mxu1 }
 0x85a   :  { %v997_v55 = vadd.f32 %v996_v1, %v995_v52 }
 0x85c   :  { %v941_v56 = vadd.f32 %v997_v55, %v962_v62 }
 0x85e   :  { %944 = vst [vmem:[#allocation10] sm:$0xff] %v941_v56 }
 0x85f   :  { %1679 = shalt.err (!%p1676_p8)
}
 0x860   :  { %s1680_s28 = scalar_lea.hbm %s2174_s6, 128 }
 0x861   :  { %p1681_p9 = scmp.ne.s32.totalorder %s2174_s6, %s1680_s28  ;;  %p1684_p10 = scmp.lt.u32.totalorder %s1680_s28, %s2174_s6 }
 0x863   :  { %p1686_p11 = pnand %p1684_p10, %p1681_p9 }
 0x865   :  { %1689 = shalt.err (!%p1686_p11)
}
 0x866   :  { %954 = dma.vmem_to_hbm [thread:$0]  %s952_s24, 128, %s2174_s6, [#allocation4]  }
 0x867   :  { %1696 = dma.done.wait [#allocation4], 128  }
 0x868   :  { %1697 = vsyncadd [#allocation4], 4294967168 }
 0x869   :  { %958 = vsyncpa [#allocation3], 1 }
 0x86a   :  { %959 = vsyncpa [#allocation6], 1 }
 0x86b   :  { %960 = vsyncpa [#allocation9], 1 }
 0x86c   :  { %961 = vsyncpa [#allocation4], 1 }

</bundles_post_ra>
